<compile_context>
chip_gen: v5e
topology: v5e:2x2
jax: 0.10.0
libtpu: 0.0.40
codegen_flags: <defaults>
</compile_context>

<pallas_src>
import math

import jax
import jax.numpy as jnp
from jax.experimental import pallas as pl
from jax.experimental.pallas import tpu as pltpu


_NEG_BIG = -1.0e30  # bias value for padded class columns (exp underflows to 0)


def _round_up(x, m):
    return ((x + m - 1) // m) * m


def _vmem_capacity_bytes():
    """Per-core VMEM capacity, with a conservative fallback."""
    try:
        info = pltpu.get_tpu_info()
        for name in ("vmem_capacity_bytes", "vmem_size_bytes", "vmem_bytes"):
            v = getattr(info, name, None)
            if isinstance(v, int) and v > 0:
                return v
    except Exception:
        pass
    return 64 * 1024 * 1024  # v7x-sized fallback: never over-provisions


def _classification_kernel(x_ref, w_ref, b_ref, o_ref, acc_ref):
    # x_ref: (TN, TK) bf16   w_ref: (TK, Cp) bf16   b_ref: (1, Cp) f32
    # o_ref: (TN, Cp)        acc_ref: (TN, Cp) f32 scratch
    k = pl.program_id(1)

    @pl.when(k == 0)
    def _init():
        acc_ref[...] = jnp.zeros_like(acc_ref)

    acc_ref[...] += jnp.dot(x_ref[...], w_ref[...],
                            preferred_element_type=jnp.float32)

    @pl.when(k == pl.num_programs(1) - 1)
    def _finalize():
        # Padded class columns get bias = -1e30 (weights there are zero), so
        # they vanish from the max / sum-exp without any in-kernel masking.
        logits = acc_ref[...] + b_ref[...]
        m = jnp.max(logits, axis=1, keepdims=True)
        shifted = logits - m
        lse = jnp.log(jnp.sum(jnp.exp(shifted), axis=1, keepdims=True))
        o_ref[...] = (shifted - lse).astype(o_ref.dtype)


def classification_forward(embeds, weight, bias, *,
                           compute_dtype=jnp.bfloat16,
                           out_dtype=jnp.float32):
    """embeds: (N, E) f32; weight: (E, C) f32; bias: (C,) f32 -> (N, C)."""
    N, E = embeds.shape
    C = weight.shape[1]

    # Lane-dense class axis.
    C_pad = _round_up(C, 128)

    # Contraction-axis tiling: keep E whole when small, otherwise 512-wide
    # tiles (multiple of 128 for lane/sublane alignment of both x and W).
    if E <= 1024:
        TK, E_pad = E, E
    else:
        TK = 512
        E_pad = _round_up(E, TK)

    x_bytes = jnp.dtype(compute_dtype).itemsize
    out_bytes = jnp.dtype(out_dtype).itemsize

    # Generation-aware VMEM budget: leave 16 MiB headroom, cap at 100 MiB
    # (v5e/v6e: 128 MiB physical -> ~100 MiB; v7x: 64 MiB -> 48 MiB).
    cap = _vmem_capacity_bytes()
    budget = max(min(cap - 16 * 1024 * 1024, 100 * 1024 * 1024),
                 32 * 1024 * 1024)

    def _fits(tn):
        need = (2 * tn * TK * x_bytes          # double-buffered x tile
                + 2 * TK * C_pad * x_bytes     # weight tile (assume 2 copies)
                + 2 * tn * C_pad * out_bytes   # double-buffered output tile
                + tn * C_pad * 4               # f32 accumulator scratch
                + 2 * C_pad * 4)               # bias
        return need <= budget

    # Batch tile: largest multiple of 256 (also a multiple of 128 -> full MXU
    # passes on every generation) that fits the budget; tiny batches just use
    # the sublane-rounded batch size.
    n8 = _round_up(N, 8)
    if n8 <= 256:
        TN = n8
    else:
        TN = 256
        for cand in range(min(2048, _round_up(n8, 256)), 255, -256):
            if _fits(cand):
                TN = cand
                break
    N_pad = _round_up(N, TN)

    # Pad + cast operands (bf16 MXU inputs, f32 accumulation in-kernel).
    x_p = embeds.astype(compute_dtype)
    if N_pad != N or E_pad != E:
        x_p = jnp.pad(x_p, ((0, N_pad - N), (0, E_pad - E)))
    w_p = weight.astype(compute_dtype)
    if E_pad != E or C_pad != C:
        w_p = jnp.pad(w_p, ((0, E_pad - E), (0, C_pad - C)))
    b_p = bias.astype(jnp.float32)
    if C_pad != C:
        b_p = jnp.pad(b_p, (0, C_pad - C), constant_values=_NEG_BIG)
    b_p = b_p.reshape(1, C_pad)

    grid = (N_pad // TN, E_pad // TK)

    out = pl.pallas_call(
        _classification_kernel,
        out_shape=jax.ShapeDtypeStruct((N_pad, C_pad), out_dtype),
        grid_spec=pltpu.PrefetchScalarGridSpec(
            num_scalar_prefetch=0,
            grid=grid,
            in_specs=[
                pl.BlockSpec((TN, TK), lambda i, k: (i, k)),      # streamed rows
                pl.BlockSpec((TK, C_pad), lambda i, k: (k, 0)),   # weight tile
                pl.BlockSpec((1, C_pad), lambda i, k: (0, 0)),    # resident bias
            ],
            out_specs=pl.BlockSpec((TN, C_pad), lambda i, k: (i, 0)),
            scratch_shapes=[pltpu.VMEM((TN, C_pad), jnp.float32)],
        ),
        compiler_params=pltpu.CompilerParams(
            dimension_semantics=("parallel", "arbitrary"),
            vmem_limit_bytes=budget,
        ),
    )(x_p, w_p, b_p)

    return out[:N, :C]


def _xavier_uniform(key, fan_in, fan_out, shape):
    # Matches nn.init.xavier_uniform_ bound = sqrt(6 / (fan_in + fan_out)).
    bound = math.sqrt(6.0 / (fan_in + fan_out))
    return jax.random.uniform(key, shape, jnp.float32, -bound, bound)


if __name__ == "__main__":
    N = 8            # batch of embeddings
    EMB_SIZE = 32
    NUM_CLASSES = 16

    key = jax.random.PRNGKey(0)
    k_x, k_w, k_b = jax.random.split(key, 3)

    embeds = jax.random.normal(k_x, (N, EMB_SIZE), jnp.float32)
    # PyTorch Linear weight is (num_classes, emb_size); kept transposed as
    # (emb_size, num_classes) for the kernel's x @ W layout.
    weight = _xavier_uniform(k_w, EMB_SIZE, NUM_CLASSES, (EMB_SIZE, NUM_CLASSES))
    bound = 1.0 / math.sqrt(EMB_SIZE)
    bias = jax.random.uniform(k_b, (NUM_CLASSES,), jnp.float32, -bound, bound)

    out = classification_forward(embeds, weight, bias)
    jax.block_until_ready(out)
    assert out.shape == (N, NUM_CLASSES)

    # Tight check vs. a reference with the same (bf16-rounded) matmul inputs.
    x_bf = embeds.astype(jnp.bfloat16).astype(jnp.float32)
    w_bf = weight.astype(jnp.bfloat16).astype(jnp.float32)
    ref_bf = jax.nn.log_softmax(x_bf @ w_bf + bias[None, :], axis=1)
    assert jnp.allclose(out, ref_bf, atol=2e-3, rtol=2e-3), "mismatch vs bf16-input reference"

    # Semantic check vs. the full-precision module forward (loose: bf16 MXU inputs).
    ref_f32 = jax.nn.log_softmax(embeds @ weight + bias[None, :], axis=1)
    assert jnp.allclose(out, ref_f32, atol=5e-2, rtol=5e-2), "mismatch vs f32 reference"

    print("KERNEL_OK")
</pallas_src>

<mosaic_0001>
module attributes {stable_mosaic.version = 11 : i64} {
  func.func @_classification_kernel(%arg0: i32, %arg1: i32, %arg2: memref<8x32xbf16, #tpu.memory_space<vmem>>, %arg3: memref<32x128xbf16, #tpu.memory_space<vmem>>, %arg4: memref<1x128xf32, #tpu.memory_space<vmem>>, %arg5: memref<8x128xf32, #tpu.memory_space<vmem>>, %arg6: memref<8x128xf32, #tpu.memory_space<vmem>>) attributes {dimension_semantics = [#tpu.dimension_semantics<parallel>, #tpu.dimension_semantics<arbitrary>], iteration_bounds = array<i64: 1, 1>, scalar_prefetch = 0 : i64, scratch_operands = 1 : i64, tpu.core_type = #tpu.core_type<tc>, window_params = [{transform_indices = @transform_0, window_bounds = array<i64: 8, 32>}, {transform_indices = @transform_1, window_bounds = array<i64: 32, 128>}, {pipeline_mode = #tpu.pipeline_mode<synchronous>, transform_indices = @transform_2, window_bounds = array<i64: 1, 128>}, {transform_indices = @transform_3, window_bounds = array<i64: 8, 128>}]} {
    %c0_i32 = arith.constant 0 : i32
    %0 = arith.cmpi eq, %arg1, %c0_i32 : i32
    %1 = arith.extui %0 : i1 to i32
    %c0_i32_0 = arith.constant 0 : i32
    %2 = arith.cmpi ne, %1, %c0_i32_0 : i32
    scf.if %2 {
      %cst_10 = arith.constant 0.000000e+00 : f32
      %12 = vector.broadcast %cst_10 : f32 to vector<8x128xf32>
      %c0_11 = arith.constant 0 : index
      %c0_12 = arith.constant 0 : index
      %13 = vector.load %arg6[%c0_11, %c0_12] : memref<8x128xf32, #tpu.memory_space<vmem>>, vector<8x128xf32>
      tpu.vector_store %arg6[%c0_11, %c0_12], %12 {strides = array<i32>} : memref<8x128xf32, #tpu.memory_space<vmem>>, vector<8x128xf32>,
    } else {
    }
    %c0 = arith.constant 0 : index
    %c0_1 = arith.constant 0 : index
    %3 = vector.load %arg6[%c0, %c0_1] : memref<8x128xf32, #tpu.memory_space<vmem>>, vector<8x128xf32>
    %c0_2 = arith.constant 0 : index
    %c0_3 = arith.constant 0 : index
    %4 = vector.load %arg2[%c0_2, %c0_3] : memref<8x32xbf16, #tpu.memory_space<vmem>>, vector<8x32xbf16>
    %c0_4 = arith.constant 0 : index
    %c0_5 = arith.constant 0 : index
    %5 = vector.load %arg3[%c0_4, %c0_5] : memref<32x128xbf16, #tpu.memory_space<vmem>>, vector<32x128xbf16>
    %cst = arith.constant dense<0.000000e+00> : vector<8x128xf32>
    %6 = tpu.matmul %4, %5, %cst {dimension_numbers = #tpu.dot_dimension_numbers<[1], [0], [0], [1], [0, 0, 1, 1], [], []>} : vector<8x32xbf16>, vector<32x128xbf16>, vector<8x128xf32> -> vector<8x128xf32>
    %7 = arith.addf %3, %6 : vector<8x128xf32>
    %c0_6 = arith.constant 0 : index
    %c0_7 = arith.constant 0 : index
    %8 = vector.load %arg6[%c0_6, %c0_7] : memref<8x128xf32, #tpu.memory_space<vmem>>, vector<8x128xf32>
    tpu.vector_store %arg6[%c0_6, %c0_7], %7 {strides = array<i32>} : memref<8x128xf32, #tpu.memory_space<vmem>>, vector<8x128xf32>,
    %c0_i32_8 = arith.constant 0 : i32
    %9 = arith.cmpi eq, %arg1, %c0_i32_8 : i32
    %10 = arith.extui %9 : i1 to i32
    %c0_i32_9 = arith.constant 0 : i32
    %11 = arith.cmpi ne, %10, %c0_i32_9 : i32
    scf.if %11 {
      %c0_10 = arith.constant 0 : index
      %c0_11 = arith.constant 0 : index
      %12 = vector.load %arg6[%c0_10, %c0_11] : memref<8x128xf32, #tpu.memory_space<vmem>>, vector<8x128xf32>
      %c0_12 = arith.constant 0 : index
      %c0_13 = arith.constant 0 : index
      %13 = vector.load %arg4[%c0_12, %c0_13] : memref<1x128xf32, #tpu.memory_space<vmem>>, vector<1x128xf32>
      %14 = vector.broadcast %13 : vector<1x128xf32> to vector<8x128xf32>
      %15 = arith.addf %12, %14 : vector<8x128xf32>
      %cst_14 = arith.constant dense<0xFF800000> : vector<8xf32>
      %16 = vector.multi_reduction <maximumf>, %15, %cst_14 [1] : vector<8x128xf32> to vector<8xf32>
      %17 = vector.shape_cast %16 : vector<8xf32> to vector<8x1xf32>
      %18 = vector.broadcast %17 : vector<8x1xf32> to vector<8x128xf32>
      %19 = arith.subf %15, %18 : vector<8x128xf32>
      %20 = math.exp %19 : vector<8x128xf32>
      %cst_15 = arith.constant dense<0.000000e+00> : vector<8xf32>
      %21 = vector.multi_reduction <add>, %20, %cst_15 [1] : vector<8x128xf32> to vector<8xf32>
      %22 = vector.shape_cast %21 : vector<8xf32> to vector<8x1xf32>
      %23 = math.log %22 : vector<8x1xf32>
      %24 = vector.broadcast %23 : vector<8x1xf32> to vector<8x128xf32>
      %25 = arith.subf %19, %24 : vector<8x128xf32>
      %c0_16 = arith.constant 0 : index
      %c0_17 = arith.constant 0 : index
      %26 = vector.load %arg5[%c0_16, %c0_17] : memref<8x128xf32, #tpu.memory_space<vmem>>, vector<8x128xf32>
      tpu.vector_store %arg5[%c0_16, %c0_17], %25 {strides = array<i32>} : memref<8x128xf32, #tpu.memory_space<vmem>>, vector<8x128xf32>,
    } else {
    }
    return
  }
  func.func @transform_0(%arg0: i32, %arg1: i32) -> (i32, i32) {
    %c0_i32 = arith.constant 0 : i32
    return %arg0, %arg1 : i32, i32
  }
  func.func @transform_1(%arg0: i32, %arg1: i32) -> (i32, i32) {
    %c0_i32 = arith.constant 0 : i32
    %c0_i32_0 = arith.constant 0 : i32
    return %arg1, %c0_i32 : i32, i32
  }
  func.func @transform_2(%arg0: i32, %arg1: i32) -> (i32, i32) {
    %c0_i32 = arith.constant 0 : i32
    %c0_i32_0 = arith.constant 0 : i32
    %c0_i32_1 = arith.constant 0 : i32
    return %c0_i32, %c0_i32_0 : i32, i32
  }
  func.func @transform_3(%arg0: i32, %arg1: i32) -> (i32, i32) {
    %c0_i32 = arith.constant 0 : i32
    %c0_i32_0 = arith.constant 0 : i32
    return %arg0, %c0_i32 : i32, i32
  }
}

</mosaic_0001>

<bundles_post_ra>
// kernel: tpu_custom_call.1
= control target key start
LH: loop header
LB: loop body
LE: loop exit
PB: predicated region body
PF: predicated region fallthrough
CT: control target
= control target key end

     0   :  { %8 = vsyncpa [#allocation4], 0  ;;  %s262_s0 = inlined_call_operand.hbm [shape: bf16[8,32], index: 0, kind: input, shape index: {}]   ;;  %s263_s1 = inlined_call_operand.hbm [shape: bf16[32,128], index: 1, kind: input, shape index: {}]   ;;  %s264_s2 = inlined_call_operand.vmem [shape: f32[1,128], index: 2, kind: input, shape index: {}]   ;;  %s265_s3 = inlined_call_operand.hbm [shape: f32[8,128], index: 3, kind: output, shape index: {}]  }
   0x1   :  { %9 = vsyncpa [#allocation7], 0 }
   0x2   :  { %10 = vsyncpa [#allocation5], 0  ;;  %s16_s14 = sshll.u32 %s262_s0, 4  ;;  %s225_s15 = smov [#allocation3]   ;;  %s17_s14 = int_to_ptr.hbm [resolvable:$true] %s16_s14 }
   0x3   :  { %s18_s16 = sshll.u32 %s225_s15, 4  ;;  %s26_s19 = sshll.u32 %s263_s1, 4  ;;  %s19_s16 = int_to_ptr.vmem [resolvable:$true] %s18_s16  ;;  %s27_s19 = int_to_ptr.hbm [resolvable:$true] %s26_s19 }
   0x4   :  { %21 = dma.hbm_to_vmem [thread:$0]  %s17_s14, 64, %s19_s16, [#allocation4]  }
   0x5   :  { %s226_s20 = smov [#allocation6]   ;;  %s227_s22 = smov 64  }
   0x6   :  { %s28_s21 = sshll.u32 %s226_s20, 4  ;;  %s228_s23 = smov 4   ;;  %s29_s21 = int_to_ptr.vmem [resolvable:$true] %s28_s21 }
   0x7   :  { %34 = dma.hbm_to_vmem [thread:$0]  %s27_s19, 256, %s29_s21, [#allocation7], %s227_s22, %s227_s22, %s228_s23  }
   0x8   :  { %219 = dma.done.wait [#allocation4], 64  }
   0x9   :  { %220 = vsyncadd [#allocation4], 4294967232 }
   0xa   :  { %221 = dma.done.wait [#allocation7], 256  }
   0xb   :  { %222 = vsyncadd [#allocation7], 4294967040  ;;  %v136_v0 = vld [vmem:[#allocation6 + $0x8] sm:$0xff]  ;;  %v135_v1 = vld [vmem:[#allocation6] sm:$0xff]  ;;  %vm69_vm0 = vcmask 261120   ;;  %s229_s24 = smov [#allocation8]  }
   0xc   :  { %79 = vmatpush.bf16.msra.mxu0 %v136_v0  ;;  %v52_v2 = vld [vmem:[#allocation3] sm:$0xf]  ;;  %s113_s25 = sshll.u32 %s229_s24, 4  ;;  %s115_s28 = sshll.u32 %s265_s3, 4  ;;  %s114_s25 = int_to_ptr.vmem [resolvable:$true] %s113_s25  ;;  %s116_s28 = int_to_ptr.hbm [resolvable:$true] %s115_s28 }
   0xd   :  { %v142_v3 = vld [vmem:[%s264_s2] ss:$0 sm:$0xff] }
  0x10   :  { %80 = vmatpush.bf16.msra.mxu0 %v135_v1 }
  0x13   :  { %134 = vmatmul.msk.bf16.vlgmr.msra.gmra.mxu0 %vm69_vm0, %v52_v2 }
  0x90   :  { %v82_v4 = vpop.f32.mrf.mxu0 }
  0x91   :  { %v96_v5 = vadd.f32 %v142_v3, %v82_v4 }
  0x93   :  { %97 = vmax.xlane.f32.xlu0 %v96_v5 }
  0x98   :  { %v84_v6 = vpop.f32.mrf.mxu0 }
 0x106   :  { %v98_v7 = vpop.xlane.xlu0 %97 }
 0x107   :  { %v99_v8 = vsub.f32 %v96_v5, %v98_v7 }
 0x109   :  { %v100_v9 = vmul.f32 1.442695, %v99_v8 }
 0x10b   :  { %143 = vpow2.f32 %v100_v9 }
 0x111   :  { %v144_v10 = vpop.eup %143 }
 0x112   :  { %102 = vadd.xlane.f32.xlu0 %v144_v10 }
 0x185   :  { %v103_v11 = vpop.xlane.xlu0 %102 }
 0x186   :  { %145 = vlog2.f32 %v103_v11 }
 0x18c   :  { %v146_v12 = vpop.eup %145 }
 0x18d   :  { %v105_v13 = vmul.f32 0.6931472, %v146_v12 }
 0x18f   :  { %v106_v14 = vsub.f32 %v99_v8, %v105_v13 }
 0x191   :  { %107 = vst [vmem:[#allocation8] sm:$0xff] %v106_v14 }
 0x192   :  { %118 = dma.vmem_to_hbm [thread:$0]  %s114_s25, 128, %s116_s28, [#allocation5]  }
 0x193   :  { %223 = dma.done.wait [#allocation5], 128  }
 0x194   :  { %224 = vsyncadd [#allocation5], 4294967168 }
 0x195   :  { %123 = vsyncpa [#allocation4], 1 }
 0x196   :  { %124 = vsyncpa [#allocation7], 1 }
 0x197   :  { %125 = vsyncpa [#allocation5], 1 }

</bundles_post_ra>
